<compile_context>
chip_gen: v6e
topology: v6e:2x2x1
jax: 0.10.0
libtpu: 0.0.40
codegen_flags: <defaults>
</compile_context>

<pallas_src>
import functools

import jax
import jax.numpy as jnp
import numpy as np
from jax.experimental import pallas as pl
from jax.experimental.pallas import tpu as pltpu


def _device_kind() -> str:
    try:
        return jax.devices()[0].device_kind.lower()
    except Exception:  # defensive: never let detection break the kernel
        return ""


def _is_v7(kind: str) -> bool:
    return ("v7" in kind) or ("7x" in kind)


def _tile_and_vmem(n: int, m: int, d: int, tile_n, kind: str):
    """Token-tile size (multiple of 8) and vmem limit, sized per TPU generation."""
    is7 = _is_v7(kind)
    vmem_limit = (56 if is7 else 96) * 1024 * 1024
    if tile_n is None:
        # Budget: double-buffered f32 x tile + ~6 live (TN, M) f32 intermediates.
        budget = (30 if is7 else 64) * 1024 * 1024
        per_row = 2 * d * 4 + 6 * m * 4 + 16
        tile_n = max(256, budget // per_row)
    tn = min(int(tile_n), 8192)
    tn = min(tn, max(8, (n // 8) * 8))        # never (much) larger than N
    tn = max(8, (tn // 8) * 8)                # sublane multiple
    return tn, vmem_limit


def _quantize_kernel(x_ref, ent_ref, esq_ref, idx_ref, cnt_ref, *,
                     tile_n: int, n_valid: int, num_code: int,
                     mask_rows: bool):
    """One grid step = one (group g, token-tile nt) pair.

    x_ref  : (TN, D)   f32   token tile of group g (columns g*D:(g+1)*D of x)
    ent_ref: (1, D, M) bf16  -2 * codebook of group g (transposed, resident)
    esq_ref: (1, 1, M) f32   precomputed ||e||^2
    idx_ref: (1, TN, 1) i32  nearest-code index per token
    cnt_ref: (1, 1, M) f32   per-(group, tile) usage counts (summed in wrapper)
    """
    x = x_ref[...].astype(jnp.bfloat16)                              # (TN, D)
    ent = ent_ref[0]                                                 # (D, M)
    esq = esq_ref[0]                                                 # (1, M)

    # ||x - e||^2 = ||x||^2 - 2 x.e + ||e||^2 ; the per-row ||x||^2 term is
    # argmin-invariant (dropped) and the -2 is folded into `ent`.
    dots = jax.lax.dot_general(x, ent, (((1,), (0,)), ((), ())),
                               preferred_element_type=jnp.float32)   # (TN, M)
    score = dots + esq

    # argmin with first-index-on-ties (matches torch.min).
    iota = jax.lax.broadcasted_iota(jnp.int32, (1, num_code), 1)     # (1, M)
    best = jnp.min(score, axis=-1, keepdims=True)                    # (TN, 1)
    idx = jnp.min(jnp.where(score <= best, iota, num_code),
                  axis=-1, keepdims=True)                            # (TN, 1)

    onehot = (iota == idx).astype(jnp.float32)                       # (TN, M)
    if mask_rows:
        # Keep rows past N (ragged last tile, undefined data) out of counts.
        rows = pl.program_id(1) * tile_n + jax.lax.broadcasted_iota(
            jnp.int32, (tile_n, 1), 0)
        onehot = jnp.where(rows < n_valid, onehot, 0.0)

    idx_ref[0] = idx
    cnt_ref[0] = jnp.sum(onehot, axis=0, keepdims=True)              # (1, M)


def quantizer_forward(x, embeddings, num_group, *, tile_n=None):
    """Forward pass of Quantizer.

    Args:
      x:          (BS, TPD, D) float
      embeddings: (G, M, D) f32 codebook (G = num_group)
      num_group:  number of groups G
      tile_n:     token-tile size (None -> auto, sized per TPU generation)

    Returns:
      (dict(x_quant=(BS, TPD, D), indices=(BS, TPD)),
       counts=(G, M))   # increment for the module's `count` buffer
    """
    BS, TPD, D = x.shape
    G, M, De = embeddings.shape
    assert G == num_group and De == D and TPD % G == 0
    N = (BS * TPD) // G

    # Lane-align the feature dim if needed (zero padding leaves ||x-e||^2
    # unchanged); with the module default code_dim=128 this is a no-op.
    if G > 1 and D % 128 != 0:
        Dp = -(-D // 128) * 128
        x_p = jnp.pad(x, ((0, 0), (0, 0), (0, Dp - D)))
        emb_p = jnp.pad(embeddings, ((0, 0), (0, 0), (0, Dp - D)))
    else:
        Dp, x_p, emb_p = D, x, embeddings

    # Natural layout: (BS, TPD, Dp) -> (N, G*Dp) is a free reshape (no
    # transpose / extra HBM pass); the BlockSpec selects group g's columns.
    x2 = x_p.reshape(N, G * Dp)

    kind = _device_kind()
    TN, vmem_limit = _tile_and_vmem(N, M, Dp, tile_n, kind)
    num_tiles = pl.cdiv(N, TN)

    # Small per-group tensors prepared once (tiny next to x):
    # (-2 * codebook)^T in bf16 and ||e||^2 in f32.
    ent = (jnp.swapaxes(emb_p, 1, 2) * (-2.0)).astype(jnp.bfloat16)  # (G, Dp, M)
    esq = jnp.sum(emb_p * emb_p, axis=-1)[:, None, :]                # (G, 1, M)

    kernel = functools.partial(
        _quantize_kernel, tile_n=TN, n_valid=N, num_code=M,
        mask_rows=(N % TN != 0))

    idx_g, cnt_t = pl.pallas_call(
        kernel,
        out_shape=(
            jax.ShapeDtypeStruct((G, N, 1), jnp.int32),
            jax.ShapeDtypeStruct((G * num_tiles, 1, M), jnp.float32),
        ),
        grid=(G, num_tiles),
        in_specs=[
            pl.BlockSpec((TN, Dp), lambda g, nt: (nt, g)),           # x tile
            pl.BlockSpec((1, Dp, M), lambda g, nt: (g, 0, 0)),       # -2*E^T
            pl.BlockSpec((1, 1, M), lambda g, nt: (g, 0, 0)),        # ||e||^2
        ],
        out_specs=(
            pl.BlockSpec((1, TN, 1), lambda g, nt: (g, nt, 0)),      # indices
            pl.BlockSpec((1, 1, M),
                         lambda g, nt: (g * num_tiles + nt, 0, 0)),  # counts
        ),
        compiler_params=pltpu.CompilerParams(
            dimension_semantics=("parallel", "parallel"),
            vmem_limit_bytes=vmem_limit),
    )(x2, ent, esq)

    idx_ng = jnp.transpose(idx_g[:, :, 0], (1, 0))                   # (N, G) tiny
    counts = jnp.sum(cnt_t.reshape(G, num_tiles, M), axis=1)         # (G, M)

    # Exact f32 row gather straight into (N, G, D): the reshape below to
    # (BS, TPD, D) is then layout-free (no post-gather transpose pass).
    xq = embeddings[jnp.arange(G)[None, :], idx_ng]                  # (N, G, D)
    x_quant = xq.reshape(BS, TPD, D)
    indices = idx_ng.reshape(BS, TPD)
    # NOTE: `counts` is the increment for the module's f32 `count` buffer
    # (exact while per-code counts stay below 2^24).
    return dict(x_quant=x_quant, indices=indices), counts


def _reference_scores(x, embeddings):
    """Per-token scores mirroring the kernel's bf16-input / f32-accum matmul.

    torch.cdist's sqrt and the per-row ||x||^2 term are argmin-invariant and
    omitted; only near-exact ties can flip indices relative to f32 torch.
    """
    G, M, _ = embeddings.shape
    xg = x.reshape(-1, G, x.shape[-1])                               # (N, G, D)
    dots = jnp.einsum('ngd,gmd->ngm', xg.astype(jnp.bfloat16),
                      embeddings.astype(jnp.bfloat16),
                      preferred_element_type=jnp.float32)
    esq = jnp.sum(embeddings * embeddings, axis=-1)                  # (G, M)
    return esq[None, :, :] - 2.0 * dots                              # (N, G, M)


if __name__ == "__main__":
    # Small config consistent with the module (code_dim=128, num_group=TPD=4).
    code_dim = 128          # D
    num_code = 256          # M
    tokens_per_data = 4     # TPD
    num_group = 4           # G (module default: == tokens_per_data)
    BS = 40                 # -> N = BS*TPD/G = 40 tokens per group

    key = jax.random.PRNGKey(0)
    k_x, k_e = jax.random.split(key)
    embeddings = jax.random.normal(
        k_e, (num_group, num_code, code_dim), jnp.float32)
    x = jax.random.normal(k_x, (BS, tokens_per_data, code_dim), jnp.float32)

    # running `count` buffer (the module updates it via scatter_add_ in forward)
    count = jnp.zeros((num_group, num_code), jnp.float32)

    # Call 1: small explicit tile -> multi-tile grid with a ragged last tile
    # (N=40, TN=16) -> exercises partial blocks + count-row masking.
    out, count_inc = quantizer_forward(x, embeddings, num_group, tile_n=16)
    out = jax.tree_util.tree_map(jax.block_until_ready, out)
    count_inc = jax.block_until_ready(count_inc)
    count = count + count_inc
    # TODO(synk): auto_reset / reset_code / reset_count / prepare_codebook are
    # stateful training-time codebook mutations outside forward(); not kernelized.

    # Call 2: auto tile size -> one tile per group, no masking.
    out2, count_inc2 = quantizer_forward(x, embeddings, num_group)
    out2 = jax.tree_util.tree_map(jax.block_until_ready, out2)
    count_inc2 = jax.block_until_ready(count_inc2)

    N = BS * tokens_per_data // num_group
    G, M = num_group, num_code

    score_ref = _reference_scores(x, embeddings)                     # (N, G, M)
    best_ref = np.asarray(jnp.min(score_ref, axis=-1))               # (N, G)
    ref_idx = np.asarray(jnp.argmin(score_ref, axis=-1))             # (N, G)
    top2 = np.asarray(jnp.sort(score_ref, axis=-1)[..., :2])
    gap = top2[..., 1] - top2[..., 0]                                # (N, G)
    score_np = np.asarray(score_ref)

    for o, c in ((out, count_inc), (out2, count_inc2)):
        assert o["x_quant"].shape == (BS, tokens_per_data, code_dim)
        assert o["indices"].shape == (BS, tokens_per_data)
        idx_k = np.asarray(o["indices"]).reshape(N, G)

        # 1) selected code is a nearest code w.r.t. reference scores (tolerance
        #    covers bf16-matmul accumulation-order differences).
        sk = np.take_along_axis(score_np, idx_k[..., None], -1)[..., 0]
        assert np.all(sk <= best_ref + 1e-3)
        # 2) exact index match wherever the top-2 gap is not a floating tie.
        clear = gap > 1e-2
        np.testing.assert_array_equal(idx_k[clear], ref_idx[clear])
        # 3) x_quant is exactly the selected f32 codebook rows, in layout.
        g_of_p = np.arange(tokens_per_data) % G
        expect_xq = np.asarray(embeddings)[g_of_p[None, :],
                                           np.asarray(o["indices"])]
        np.testing.assert_array_equal(np.asarray(o["x_quant"]), expect_xq)
        # 4) counts == histogram of the emitted indices.
        cnt_chk = np.zeros((G, M), np.float32)
        np.add.at(cnt_chk,
                  (np.tile(np.arange(G), (N, 1)).ravel(), idx_k.ravel()), 1.0)
        np.testing.assert_array_equal(np.asarray(c), cnt_chk)

    # The two tilings must agree exactly, and the running buffer sums correctly.
    np.testing.assert_array_equal(np.asarray(out["indices"]),
                                  np.asarray(out2["indices"]))
    np.testing.assert_array_equal(np.asarray(out["x_quant"]),
                                  np.asarray(out2["x_quant"]))
    assert float(jnp.sum(count)) == BS * tokens_per_data

    print("KERNEL_OK")
</pallas_src>

<mosaic_0001>
module attributes {stable_mosaic.version = 11 : i64} {
  func.func @_quantize_kernel(%arg0: i32, %arg1: i32, %arg2: memref<16x128xf32, #tpu.memory_space<vmem>>, %arg3: memref<1x128x256xbf16, #tpu.memory_space<vmem>>, %arg4: memref<1x1x256xf32, #tpu.memory_space<vmem>>, %arg5: memref<1x16x1xi32, #tpu.memory_space<vmem>>, %arg6: memref<1x1x256xf32, #tpu.memory_space<vmem>>) attributes {dimension_semantics = [#tpu.dimension_semantics<parallel>, #tpu.dimension_semantics<parallel>], iteration_bounds = array<i64: 4, 3>, scalar_prefetch = 0 : i64, scratch_operands = 0 : i64, tpu.core_type = #tpu.core_type<tc>, window_params = [{transform_indices = @transform_0, window_bounds = array<i64: 16, 128>}, {transform_indices = @transform_1, window_bounds = array<i64: 1, 128, 256>}, {transform_indices = @transform_2, window_bounds = array<i64: 1, 1, 256>}, {transform_indices = @transform_3, window_bounds = array<i64: 1, 16, 1>}, {transform_indices = @transform_4, window_bounds = array<i64: 1, 1, 256>}]} {
    %c0 = arith.constant 0 : index
    %c0_0 = arith.constant 0 : index
    %0 = vector.load %arg2[%c0, %c0_0] : memref<16x128xf32, #tpu.memory_space<vmem>>, vector<16x128xf32>
    %1 = arith.truncf %0 : vector<16x128xf32> to vector<16x128xbf16>
    %c0_1 = arith.constant 0 : index
    %c0_2 = arith.constant 0 : index
    %c0_3 = arith.constant 0 : index
    %2 = vector.load %arg3[%c0_1, %c0_2, %c0_3] : memref<1x128x256xbf16, #tpu.memory_space<vmem>>, vector<1x128x256xbf16>
    %3 = vector.shape_cast %2 : vector<1x128x256xbf16> to vector<128x256xbf16>
    %c0_4 = arith.constant 0 : index
    %c0_5 = arith.constant 0 : index
    %c0_6 = arith.constant 0 : index
    %4 = vector.load %arg4[%c0_4, %c0_5, %c0_6] : memref<1x1x256xf32, #tpu.memory_space<vmem>>, vector<1x1x256xf32>
    %5 = vector.shape_cast %4 : vector<1x1x256xf32> to vector<1x256xf32>
    %cst = arith.constant dense<0.000000e+00> : vector<16x256xf32>
    %6 = tpu.matmul %1, %3, %cst {dimension_numbers = #tpu.dot_dimension_numbers<[1], [0], [0], [1], [0, 0, 1, 1], [], []>} : vector<16x128xbf16>, vector<128x256xbf16>, vector<16x256xf32> -> vector<16x256xf32>
    %7 = vector.broadcast %5 : vector<1x256xf32> to vector<16x256xf32>
    %8 = arith.addf %6, %7 : vector<16x256xf32>
    %9 = tpu.iota {dimensions = array<i32: 1>} : vector<1x256xi32>
    %cst_7 = arith.constant dense<0x7F800000> : vector<16xf32>
    %10 = vector.multi_reduction <minimumf>, %8, %cst_7 [1] : vector<16x256xf32> to vector<16xf32>
    %11 = vector.shape_cast %10 : vector<16xf32> to vector<16x1xf32>
    %12 = vector.broadcast %11 : vector<16x1xf32> to vector<16x256xf32>
    %13 = arith.cmpf ole, %8, %12 : vector<16x256xf32>
    %c256_i32 = arith.constant 256 : i32
    %14 = vector.shape_cast %9 : vector<1x256xi32> to vector<1x256xi32>
    %15 = vector.broadcast %14 : vector<1x256xi32> to vector<16x256xi32>
    %16 = vector.broadcast %c256_i32 : i32 to vector<16x256xi32>
    %17 = arith.select %13, %15, %16 : vector<16x256xi1>, vector<16x256xi32>
    %cst_8 = arith.constant dense<2147483647> : vector<16xi32>
    %18 = vector.multi_reduction <minsi>, %17, %cst_8 [1] : vector<16x256xi32> to vector<16xi32>
    %19 = vector.shape_cast %18 : vector<16xi32> to vector<16x1xi32>
    %20 = vector.broadcast %9 : vector<1x256xi32> to vector<16x256xi32>
    %21 = vector.broadcast %19 : vector<16x1xi32> to vector<16x256xi32>
    %22 = arith.cmpi eq, %20, %21 : vector<16x256xi32>
    %23 = arith.extui %22 : vector<16x256xi1> to vector<16x256xi32>
    %24 = arith.sitofp %23 : vector<16x256xi32> to vector<16x256xf32>
    %c16_i32 = arith.constant 16 : i32
    %25 = arith.muli %arg1, %c16_i32 : i32
    %26 = tpu.iota {dimensions = array<i32: 0>} : vector<16x1xi32>
    %27 = vector.broadcast %25 : i32 to vector<16x1xi32>
    %28 = arith.addi %27, %26 : vector<16x1xi32>
    %c40_i32 = arith.constant 40 : i32
    %29 = vector.broadcast %c40_i32 : i32 to vector<16x1xi32>
    %30 = arith.cmpi slt, %28, %29 : vector<16x1xi32>
    %cst_9 = arith.constant 0.000000e+00 : f32
    %31 = vector.shape_cast %30 : vector<16x1xi1> to vector<16x1xi1>
    %32 = vector.broadcast %31 : vector<16x1xi1> to vector<16x256xi1>
    %33 = vector.broadcast %cst_9 : f32 to vector<16x256xf32>
    %34 = arith.select %32, %24, %33 : vector<16x256xi1>, vector<16x256xf32>
    %c0_10 = arith.constant 0 : index
    %c0_11 = arith.constant 0 : index
    %c0_12 = arith.constant 0 : index
    %35 = vector.load %arg5[%c0_10, %c0_11, %c0_12] : memref<1x16x1xi32, #tpu.memory_space<vmem>>, vector<1x16x1xi32>
    %36 = vector.shape_cast %35 : vector<1x16x1xi32> to vector<16x1xi32>
    %37 = vector.shape_cast %19 : vector<16x1xi32> to vector<1x16x1xi32>
    tpu.vector_store %arg5[%c0_10, %c0_11, %c0_12], %37 {strides = array<i32>} : memref<1x16x1xi32, #tpu.memory_space<vmem>>, vector<1x16x1xi32>,
    %cst_13 = arith.constant dense<0.000000e+00> : vector<256xf32>
    %38 = vector.multi_reduction <add>, %34, %cst_13 [0] : vector<16x256xf32> to vector<256xf32>
    %39 = vector.shape_cast %38 : vector<256xf32> to vector<1x256xf32>
    %c0_14 = arith.constant 0 : index
    %c0_15 = arith.constant 0 : index
    %c0_16 = arith.constant 0 : index
    %40 = vector.load %arg6[%c0_14, %c0_15, %c0_16] : memref<1x1x256xf32, #tpu.memory_space<vmem>>, vector<1x1x256xf32>
    %41 = vector.shape_cast %40 : vector<1x1x256xf32> to vector<1x256xf32>
    %42 = vector.shape_cast %39 : vector<1x256xf32> to vector<1x1x256xf32>
    tpu.vector_store %arg6[%c0_14, %c0_15, %c0_16], %42 {strides = array<i32>} : memref<1x1x256xf32, #tpu.memory_space<vmem>>, vector<1x1x256xf32>,
    return
  }
  func.func @transform_0(%arg0: i32, %arg1: i32) -> (i32, i32) {
    %c0_i32 = arith.constant 0 : i32
    return %arg1, %arg0 : i32, i32
  }
  func.func @transform_1(%arg0: i32, %arg1: i32) -> (i32, i32, i32) {
    %c0_i32 = arith.constant 0 : i32
    %c0_i32_0 = arith.constant 0 : i32
    %c0_i32_1 = arith.constant 0 : i32
    return %arg0, %c0_i32, %c0_i32_0 : i32, i32, i32
  }
  func.func @transform_2(%arg0: i32, %arg1: i32) -> (i32, i32, i32) {
    %c0_i32 = arith.constant 0 : i32
    %c0_i32_0 = arith.constant 0 : i32
    %c0_i32_1 = arith.constant 0 : i32
    return %arg0, %c0_i32, %c0_i32_0 : i32, i32, i32
  }
  func.func @transform_3(%arg0: i32, %arg1: i32) -> (i32, i32, i32) {
    %c0_i32 = arith.constant 0 : i32
    %c0_i32_0 = arith.constant 0 : i32
    return %arg0, %arg1, %c0_i32 : i32, i32, i32
  }
  func.func @transform_4(%arg0: i32, %arg1: i32) -> (i32, i32, i32) {
    %c3_i32 = arith.constant 3 : i32
    %0 = arith.muli %arg0, %c3_i32 : i32
    %1 = arith.addi %0, %arg1 : i32
    %c0_i32 = arith.constant 0 : i32
    %c0_i32_0 = arith.constant 0 : i32
    %c0_i32_1 = arith.constant 0 : i32
    return %1, %c0_i32, %c0_i32_0 : i32, i32, i32
  }
}

</mosaic_0001>

<bundles_post_ra>
// kernel: tpu_custom_call.1
= control target key start
LH: loop header
LB: loop body
LE: loop exit
PB: predicated region body
PF: predicated region fallthrough
CT: control target
= control target key end

     0   :  { %s1987_s0 = inlined_call_operand.hbm [shape: f32[40,512], index: 0, kind: input, shape index: {}]   ;;  %s1988_s1 = inlined_call_operand.hbm [shape: bf16[4,128,256], index: 1, kind: input, shape index: {}]   ;;  %s1989_s2 = inlined_call_operand.hbm [shape: f32[4,1,256], index: 2, kind: input, shape index: {}]   ;;  %s1990_s3 = inlined_call_operand.vmem [shape: s32[4,40,1], index: 3, kind: output, shape index: {0}]   ;;  %s1991_s4 = inlined_call_operand.hbm [shape: f32[12,1,256], index: 4, kind: output, shape index: {1}]  }
   0x1   :  { %2003 = sst [smem:[#allocation26_spill]] %s1987_s0 }
   0x2   :  { %2004 = sst [smem:[#allocation27_spill]] %s1990_s3 }
   0x3   :  { %2005 = sst [smem:[#allocation28_spill]] %s1991_s4 }
   0x4   :  { %10 = vsyncpa [#allocation3], 0 }
   0x5   :  { %12 = vsyncpa [#allocation3 + $0x1], 0 }
   0x6   :  { %13 = vsyncpa [#allocation6], 0 }
   0x7   :  { %15 = vsyncpa [#allocation6 + $0x1], 0 }
   0x8   :  { %16 = vsyncpa [#allocation4], 0 }
   0x9   :  { %18 = vsyncpa [#allocation4 + $0x1], 0  ;;  %s1579_s15 = smov 0   ;;  %s1581_s16 = smov 0  }
   0xa   :  { %s1583_s17 = smov 0   ;;  %s1585_s18 = smov 0  }
   0xb   :  { %s1587_s19 = smov 0   ;;  %s1589_s20 = smov 0  }
   0xc   :  { %s1591_s21 = smov 0   ;;  %s1593_s22 = smov 0  }
   0xd   :  { %s1595_s23 = smov 0   ;;  %s1597_s24 = smov 0  }
   0xe   :  { %s1599_s25 = smov 0   ;;  %s1601_s26 = smov 0  }
   0xf   :  { %s1603_s27 = smov 0   ;;  %s1605_s28 = smov 0  }
  0x10 LB: > { %2006 = sst [smem:[#allocation13_spill]] %s1456_s15  ;;  %s1648_s29 = sadd.s32 4294967295, %s1508_s28   ;;  %s1508_s28 = sphi %s1605_s28, %s24_s28   ;;  %s1504_s27 = sphi %s1603_s27, %s2059_s27   ;;  %s1500_s26 = sphi %s1601_s26, %s2058_s26   ;;  %s1496_s25 = sphi %s1599_s25, %s2057_s25   ;;  %s1492_s24 = sphi %s1597_s24, %s2047_s24   ;;  %s1488_s23 = sphi %s1595_s23, %s2046_s23   ;;  %s1484_s22 = sphi %s1593_s22, %s2056_s22   ;;  %s1480_s21 = sphi %s1591_s21, %s2055_s21   ;;  %s1476_s20 = sphi %s1589_s20, %s2054_s20   ;;  %s1472_s19 = sphi %s1587_s19, %s2053_s19   ;;  %s1468_s18 = sphi %s1585_s18, %s2052_s18   ;;  %s1464_s17 = sphi %s1583_s17, %s2043_s17   ;;  %s1460_s16 = sphi %s1581_s16, %s2051_s16   ;;  %s1456_s15 = sphi %s1579_s15, %s2050_s15  }
  0x11   : > { %2007 = sst [smem:[#allocation14_spill]] %s1464_s17  ;;  %s33_s5 = sadd.s32 1, %s1500_s26 }
  0x12   : > { %2008 = sst [smem:[#allocation15_spill]] %s1488_s23  ;;  %s36_s6 = sadd.s32 1, %s1504_s27 }
  0x13   : > { %2009 = sst [smem:[#allocation16_spill]] %s1492_s24  ;;  %p34_p0 = scmp.ge.s32.totalorder %s33_s5, 3 }
  0x14   : > { %2010 = sst [smem:[#allocation17_spill]] %s1496_s25  ;;  %s45_s7 = sadd.s32 1, %s1488_s23 }
  0x15   : > { %2011 = sst [smem:[#allocation18_spill]] %s1500_s26  ;;  %p52_p1 = scmp.ne.s32.totalorder %s1488_s23, %s1484_s22 }
  0x16   : > { %p53_p2 = scmp.eq.s32.totalorder %s1508_s28, 0  ;;  %s2061_s5 = smov (%p34_p0, %s33_s5), 0 }
  0x17   : > { %2012 = sst [smem:[#allocation19_spill]] %s2061_s5  ;;  %s2063_s6 = smov (!%p34_p0, %s36_s6), %s1504_s27 }
  0x18   : > { %s40_s8 = ssub.s32 %s1500_s26, %s2061_s5  ;;  %p1667_p3 = por %p53_p2, %p52_p1 }
  0x19   : > { %p38_p4 = scmp.ge.s32.totalorder %s2063_s6, 4  ;;  %p58_p5 = scmp.ne.s32.totalorder %s1484_s22, %s1480_s21 }
  0x1a   : > { %p59_p6 = scmp.eq.s32.totalorder %s1648_s29, 0  ;;  %s71_s10 = sadd.s32 1, %s1476_s20 }
  0x1b   : > { %s2065_s6 = smov (%p38_p4, %s2063_s6), 0  ;;  %p78_p8 = scmp.ne.s32.totalorder %s1476_s20, %s1472_s19 }
  0x1c   : > { %2014 = sst [smem:[#allocation20_spill]] %s2065_s6  ;;  %p1678_p7 = por %p59_p6, %p58_p5 }
  0x1d   : > { %s41_s12 = ssub.s32 %s1504_s27, %s2065_s6  ;;  %p84_p9 = scmp.ne.s32.totalorder %s1472_s19, %s1468_s18 }
  0x1e   : > { %s42_s13 = sor.u32 %s41_s12, %s40_s8  ;;  %p69_p10 = scmp.eq.s32.totalorder %s41_s12, 0 }
  0x1f   : > { %p43_p11 = scmp.eq.s32.totalorder %s42_s13, 0  ;;  %p1690_p12 = por %p78_p8, %p53_p2 }
  0x20   : > { %s1695_s21 = scalar_select %p69_p10, %s1476_s20, %s71_s10  }
  0x21   : > { %s1698_s30 = scalar_select %p43_p11, %s1488_s23, %s45_s7  }
  0x22   : > { %2017 = sst [smem:[#allocation21_spill]] %s1695_s21  ;;  %p1702_p13 = por %p84_p9, %p59_p6 }
  0x23   : > { %2018 = sst [smem:[#allocation22_spill]] %s1698_s30  ;;  %p136_p0 = scmp.eq.s32.totalorder %s1648_s29, 11 }
  0x24   : > { %s148_s18 = smul.u32 3, %s1504_s27  ;;  %s155_s8 = sadd.s32 1, %s1464_s17 }
  0x25   : > { %p1712_p4 = por %p136_p0, %p52_p1  ;;  %s150_s13 = smul.u32 3, %s2065_s6 }
  0x26   : > { %s149_s3 = sadd.s32 %s1500_s26, %s148_s18  ;;  %p165_p2 = scmp.ne.s32.totalorder %s1464_s17, %s1460_s16 }
  0x27   : > { %s2020_s12 = scalar_select %p1712_p4, 1, 0 }
  0x28   : > { %s151_s10 = sadd.s32 %s150_s13, %s2061_s5  ;;  %p171_p5 = scmp.ne.s32.totalorder %s1460_s16, %s1456_s15 }
  0x29   : > { %s152_s7 = ssub.s32 %s149_s3, %s151_s10  ;;  %p1723_p8 = por %p165_p2, %p136_p0 }
  0x2a   : > { %p153_p6 = scmp.eq.s32.totalorder %s152_s7, 0  ;;  %s2023_s21 = sadd.s32 4294967294, %s1508_s28  }
  0x2b   : > { %s2021_s30 = scalar_select %p1723_p8, 1, 0 }
  0x2c   : > { %p172_p9 = scmp.eq.s32.totalorder %s2023_s21, 11  ;;  %p961_p1 = scmp.ge.s32.totalorder %s1508_s28, 12 }
  0x2d   : > { %2022 = sst [smem:[#allocation23_spill]] %s2021_s30 }
  0x2e   : > { %s1730_s25 = scalar_select %p153_p6, %s1464_s17, %s155_s8  }
  0x2f   : > { %p1732_p10 = por %p172_p9, %p171_p5  ;;  %188 = sbr.rel (%p961_p1) target bundleno = 122 (0x7a), region = 16 }
  0x30   : > { %2024 = sst [smem:[#allocation24_spill]] %s1730_s25 }
  0x31   : > { %s2025_s24 = scalar_select %p1732_p10, 1, 0 }
  0x33   : > { %2026 = sst [smem:[#allocation25_spill]] %s2025_s24 }
  0x34   : > { %191 = sbr.rel (!%p1667_p3) target bundleno = 92 (0x5c), region = 20  ;;  %s192_s3 = sand.u32 (%p1667_p3), 1, %s1488_s23  }
  0x35   : > { %s963_s18 = sshll.u32 (%p1667_p3), %s1500_s26, 1  ;;  %s962_s13 = sshll.u32 (%p1667_p3), %s192_s3, 4 }
  0x36   : > { %s198_s10 = ssub.s32 (%p1667_p3), 5, %s963_s18  ;;  %s1744_s7 = scalar_lea.sflag (%p1667_p3), [#allocation3], %s192_s3 }
  0x37   : > { %p199_p11 = scmp.lt.s32.totalorder (%p1667_p3), %s198_s10, 2  ;;  %s196_s6 = scalar_lea.vmem (%p1667_p3), [#allocation2], %s962_s13 }
  0x39   : > { %s2067_s10 = smov (!%p199_p11, %s198_s10), 2 }
  0x3a   : > { %s1741_s21 = sshll.u32 %s2067_s10, 7 }
  0x3b   : > { %s203_s8 = ssub.s32 256, %s1741_s21 }
  0x3c   : > { %204 = vsyncadd %s1744_s7, %s203_s8  ;;  %p965_p3 = scmp.ne.s32.totalorder %s1741_s21, 0  ;;  %s1023_s9 = sshll.u32 %s1500_s26, 3 }
  0x3d   : > { %s207_s5 = sadd.s32 %s1504_s27, %s1023_s9  ;;  %s211_s18 = sshll.u32 %s196_s6, 4  ;;  %s1750_s18 = int_to_ptr.vmem [resolvable:$true] %s211_s18 }
  0x3e   : > { %s967_s23 = sshll.u32 %s207_s5, 7  ;;  %s2027_s0 = sld [smem:[#allocation26_spill]] }
  0x44   : > { %s1755_s3 = scalar_lea.hbm %s2027_s0, %s967_s23  ;;  %s1254_s9 = scalar_lea.hbm %s2027_s0, 2560 }
  0x45   : > { %s1250_s13 = scalar_lea.hbm %s1755_s3, %s1741_s21 }
  0x46   : > { %p1251_p0 = scmp.ne.s32.totalorder %s1755_s3, %s1250_s13  ;;  %p1256_p6 = scmp.lt.s32.totalorder %s1254_s9, %s1250_s13 }
  0x48   : > { %p1252_p2 = pnand %p1251_p0, %p965_p3 }
  0x4a   : > { %p1253_p5 = pneg %p1252_p2 }
  0x4c   : > { %p1258_p9 = pnand %p1256_p6, %p1253_p5 }
  0x4e   : > { %1261 = shalt.err (!%p1258_p9)
}
  0x4f   : > { %s1262_s23 = scalar_lea.vmem %s1750_s18, %s1741_s21  ;;  %s1542_s25 = smov [#allocation2]  }
  0x50   : > { %p1263_p1 = scmp.ne.s32.totalorder %s1750_s18, %s1262_s23  ;;  %s1266_s5 = sshll.u32 %s1542_s25, 4  ;;  %s1267_s5 = int_to_ptr.vmem [resolvable:$false] %s1266_s5 }
  0x51   : > { %s1268_s6 = scalar_lea.vmem %s1267_s5, 512  ;;  %p1269_p0 = scmp.lt.s32.totalorder %s1750_s18, %s1267_s5 }
  0x52   : > { %p1264_p11 = pnand %p1263_p1, %p965_p3  ;;  %p1270_p2 = scmp.lt.s32.totalorder %s1268_s6, %s1262_s23 }
  0x54   : > { %p1265_p10 = pneg %p1264_p11  ;;  %p1271_p8 = por %p1270_p2, %p1269_p0 }
  0x56   : > { %p1272_p4 = pnand %p1271_p8, %p1265_p10 }
  0x58   : > { %1275 = shalt.err (!%p1272_p4)
}
  0x59   : > { %s1543_s17 = smov 512   ;;  %s1544_s10 = smov 128  }
  0x5a   : > { %s1545_s13 = smov 8  }
  0x5b   : > { %217 = dma.hbm_to_vmem [thread:$0]  (%p965_p3), %s1755_s3, %s1741_s21, %s1750_s18, %s1744_s7, %s1543_s17, %s1544_s10, %s1545_s13  }
  0x5c PF: > { %s221_s8 = sand.u32 1, %s1508_s28   ;;  %s223_s9 = sand.u32 1, %s1476_s20  }
  0x5d   : > { %s970_s23 = sshll.u32 %s223_s9, 7  ;;  %s1024_s25 = sshll.u32 %s1504_s27, 11 }
  0x5e   : > { %s231_s0 = scalar_lea.hbm %s1988_s1, %s1024_s25  ;;  %s225_s26 = scalar_lea.vmem [#allocation5], %s970_s23 }
  0x5f   : > { %s232_s24 = sshll.u32 %s225_s26, 4  ;;  %s973_s15 = sshll.u32 %s223_s9, 1  ;;  %s233_s24 = int_to_ptr.vmem [resolvable:$true] %s232_s24 }
  0x60   : > { %s1783_s30 = scalar_lea.sflag [#allocation6], %s221_s8  ;;  %s1288_s21 = scalar_lea.vmem %s233_s24, 2048 }
  0x61   : > { %p1289_p4 = scmp.ne.s32.totalorder %s233_s24, %s1288_s21  ;;  %s1546_s7 = smov [#allocation5]  }
  0x62   : > { %s1292_s18 = sshll.u32 %s1546_s7, 4  ;;  %s1293_s18 = int_to_ptr.vmem [resolvable:$false] %s1292_s18 }
  0x63   : > { %p1290_p8 = pnand %p1289_p4, %p1690_p12  ;;  %s1294_s3 = scalar_lea.vmem %s1293_s18, 4096 }
  0x64   : > { %p1295_p3 = scmp.lt.s32.totalorder %s233_s24, %s1293_s18  ;;  %p1296_p5 = scmp.lt.s32.totalorder %s1294_s3, %s1288_s21 }
  0x65   : > { %p1291_p10 = pneg %p1290_p8 }
  0x66   : > { %p1297_p6 = por %p1296_p5, %p1295_p3 }
  0x68   : > { %p1298_p9 = pnand %p1297_p6, %p1291_p10 }
  0x6a   : > { %1301 = shalt.err (!%p1298_p9)
}
  0x6b   : > { %s1547_s17 = smov 128   ;;  %s1548_s26 = smov 8  }
  0x6c   : > { %1030 = dma.hbm_to_vmem [thread:$0]  (%p1690_p12), %s231_s0, 2048, %s233_s24, %s1783_s30, %s1547_s17, %s1547_s17, %s1548_s26  }
  0x6d   : > { %s1025_s10 = sshll.u32 %s1504_s27, 5  ;;  %s246_s23 = scalar_lea.vmem [#allocation7], %s973_s15 }
  0x6e   : > { %s252_s9 = scalar_lea.hbm %s1989_s2, %s1025_s10  ;;  %s254_s25 = sshll.u32 %s246_s23, 4  ;;  %s255_s25 = int_to_ptr.vmem [resolvable:$true] %s254_s25 }
  0x6f   : > { %s1314_s5 = scalar_lea.vmem %s255_s25, 32  ;;  %s1549_s6 = smov [#allocation7]  }
  0x70   : > { %p1315_p1 = scmp.ne.s32.totalorder %s255_s25, %s1314_s5  ;;  %s1318_s21 = sshll.u32 %s1549_s6, 4  ;;  %s1319_s21 = int_to_ptr.vmem [resolvable:$false] %s1318_s21 }
  0x71   : > { %s1320_s7 = scalar_lea.vmem %s1319_s21, 64  ;;  %p1321_p2 = scmp.lt.s32.totalorder %s255_s25, %s1319_s21 }
  0x72   : > { %p1316_p11 = pnand %p1315_p1, %p1690_p12  ;;  %p1322_p4 = scmp.lt.s32.totalorder %s1320_s7, %s1314_s5 }
  0x74   : > { %p1317_p0 = pneg %p1316_p11  ;;  %p1323_p8 = por %p1322_p4, %p1321_p2 }
  0x76   : > { %p1324_p10 = pnand %p1323_p8, %p1317_p0 }
  0x78   : > { %1327 = shalt.err (!%p1324_p10)
}
  0x79   : > { %1031 = dma.hbm_to_vmem [thread:$0]  (%p1690_p12), %s252_s9, 32, %s255_s25, %s1783_s30  }
  0x7a PF: > { %p976_p3 = scmp.ge.s32.totalorder %s1508_s28, 1  ;;  %p259_p5 = scmp.lt.s32.totalorder %s1508_s28, 13 }
  0x7c   : > { %p260_p6 = pnand %p976_p3, %p259_p5 }
  0x7d   : > { %s265_s0 = sand.u32 (!%p260_p6), 1, %s1484_s22  }
  0x7e   : > { %263 = sbr.rel (%p260_p6) target bundleno = 891 (0x37b), region = 32  ;;  %s1802_s15 = sshll.u32 (!%p260_p6), %s265_s0, 4 }
  0x7f   : > { %s266_s24 = scalar_lea.sflag (!%p260_p6), [#allocation3], %s265_s0  ;;  %s269_s18 = scalar_lea.vmem (!%p260_p6), [#allocation2], %s1802_s15 }
  0x83   : > { %1443 = dma.done.wait (%p1678_p7), %s266_s24, 256  }
  0x84   : > { %1445 = vsyncadd (%p1678_p7), %s266_s24, 4294967040  ;;  %s274_s30 = sand.u32 1, %s1648_s29   ;;  %s276_s14 = sand.u32 1, %s1472_s19  }
  0x85   : > { %s978_s3 = sshll.u32 %s276_s14, 7  ;;  %s275_s17 = scalar_lea.sflag [#allocation6], %s274_s30 }
  0x86   : > { %s1813_s26 = scalar_lea.vmem [#allocation5], %s978_s3 }
  0x87   : > { %1447 = dma.done.wait (%p1702_p13), %s275_s17, 2080  }
  0x88   : > { %1449 = vsyncadd (%p1702_p13), %s275_s17, 4294965216  ;;  %v1550_v0 = vmov 0   ;;  %v1226_v1 = vld [vmem:[%s1813_s26 + $0x74] ss:$8 sps:$4 sm:$0xff]   ;;  %v1228_v2 = vld [vmem:[%s1813_s26 + $0x70] ss:$8 sps:$4 sm:$0xff]   ;;  %v360_v20 = vlaneseq }
  0x89   : > { %482 = vmatprep.mubr.bf16.mxu0 %v1550_v0  ;;  %450 = vmatprep.subr.bf16.mxu0 %v1226_v1  ;;  %v1229_v3 = vld [vmem:[%s1813_s26 + $0x64] ss:$8 sps:$4 sm:$0xff]   ;;  %v1231_v4 = vld [vmem:[%s1813_s26 + $0x60] ss:$8 sps:$4 sm:$0xff]   ;;  %v1232_v5 = vld [vmem:[%s1813_s26 + $0x54] ss:$8 sps:$4 sm:$0xff]  }
  0x8a   : > { %451 = vmatpush1.bf16.msra.mxu0 %v1228_v2  ;;  %v1234_v6 = vld [vmem:[%s1813_s26 + $0x50] ss:$8 sps:$4 sm:$0xff]   ;;  %v1235_v7 = vld [vmem:[%s1813_s26 + $0x44] ss:$8 sps:$4 sm:$0xff]   ;;  %v1237_v8 = vld [vmem:[%s1813_s26 + $0x40] ss:$8 sps:$4 sm:$0xff]  }
  0x8b   : > { %452 = vmatprep.subr.bf16.mxu0 %v1229_v3  ;;  %v1238_v9 = vld [vmem:[%s1813_s26 + $0x34] ss:$8 sps:$4 sm:$0xff]   ;;  %v1240_v10 = vld [vmem:[%s1813_s26 + $0x30] ss:$8 sps:$4 sm:$0xff]   ;;  %v1241_v11 = vld [vmem:[%s1813_s26 + $0x24] ss:$8 sps:$4 sm:$0xff]  }
  0x8c   : > { %v1243_v12 = vld [vmem:[%s1813_s26 + $0x20] ss:$8 sps:$4 sm:$0xff]   ;;  %v1244_v13 = vld [vmem:[%s1813_s26 + $0x14] ss:$8 sps:$4 sm:$0xff]   ;;  %v1246_v14 = vld [vmem:[%s1813_s26 + $0x10] ss:$8 sps:$4 sm:$0xff]  }
  0x8d   : > { %v1247_v15 = vld [vmem:[%s1813_s26 + $0x4] ss:$8 sps:$4 sm:$0xff]   ;;  %v1249_v16 = vld [vmem:[%s1813_s26] ss:$8 sps:$4 sm:$0xff]   ;;  %s979_s4 = sshll.u32 %s276_s14, 1  ;;  %v1842_v21 = vshrl.u32 %v360_v20, 7 }
  0x8e   : > { %453 = vmatpush1.bf16.msra.mxu0 %v1231_v4  ;;  %v339_v17 = vld [vmem:[%s269_s18] sm:$0xff]  ;;  %v340_v18 = vld [vmem:[%s269_s18 + $0x8] sm:$0xff]  ;;  %s287_s29 = scalar_lea.vmem [#allocation7], %s979_s4  ;;  %v1847_v37 = vand.u32 127, %v360_v20  ;;  %s2028_s11 = sld [smem:[#allocation16_spill]]  ;;  %vm571_vm8 = vcmask 7168  }
  0x8f   : > { %454 = vmatprep.subr.bf16.mxu0 %v1232_v5  ;;  %v341_v19 = vpack.c.bf16 %v340_v18, %v339_v17  ;;  %v362_v22 = vsub.s32 0, %v1842_v21  ;;  %v366_v23 = vsub.s32 1, %v1842_v21  ;;  %v358_v24 = vld [vmem:[%s287_s29] sm:$0x3]  ;;  %s323_s10 = sand.u32 1, %s1460_s16   ;;  %v557_v61 = vadd.s32 8, %v1842_v21 }
  0x90   : > { %v1850_v38 = vadd.s32 128, %v1847_v37  ;;  %s1863_s8 = scalar_lea.vmem [#allocation8], %s1802_s15   ;;  %s1874_s9 = sshll.u32 %s323_s10, 1  ;;  %vm608_vm15 = vcmp.lt.s32.totalorder %v360_v20, 256 }
  0x91   : > { %v363_v25 = vrot.slane %v358_v24, %v362_v22  ;;  %v367_v26 = vrot.slane %v358_v24, %v366_v23  ;;  %v1552_v24 = vmov 1966171168   ;;  %s325_s23 = scalar_lea.vmem [#allocation9], %s1874_s9  ;;  %s1882_s25 = scalar_lea.sflag [#allocation4], %s323_s10 }
  0x92   : > { %455 = vmatpush1.bf16.msra.mxu0 %v1234_v6  ;;  %p2029_p7 = scmp.ne.s32.totalorder %s2020_s12, 0 }
  0x93   : > { %456 = vmatprep.subr.bf16.mxu0 %v1235_v7  ;;  %s2030_s5 = sld [smem:[#allocation16_spill]] (%p2029_p7) }
  0x94   : > { %s1002_s13 = sshll.u32 %s2028_s11, 4  ;;  %s2031_s6 = sld [smem:[#allocation17_spill]] (%p2029_p7) }
  0x95   : > { %v558_v0 = vstv %s1002_s13  ;;  %s2032_s14 = sld [smem:[#allocation27_spill]] (%p2029_p7) }
  0x96   : > { %457 = vmatpush1.bf16.msra.mxu0 %v1237_v8  ;;  %v559_v3 = vadd.s32 %v558_v0, %v1842_v21  ;;  %v560_v4 = vadd.s32 %v558_v0, %v557_v61 }
  0x97   : > { %458 = vmatprep.subr.bf16.mxu0 %v1238_v9  ;;  %v1551_v9 = vmov 0.0  }
  0x98   : > { %vm561_vm11 = vcmp.lt.s32.totalorder %v559_v3, 40  ;;  %vm562_vm12 = vcmp.lt.s32.totalorder %v560_v4, 40 }
  0x99   : > { %s1005_s21 = sshll.u32 (%p2029_p7), %s2030_s5, 1 }
  0x9a   : > { %459 = vmatpush1.bf16.msra.mxu0 %v1240_v10  ;;  %s1029_s7 = smul.u32 (%p2029_p7), 5, %s2031_s6  ;;  %s624_s0 = ssub.s32 (%p2029_p7), 5, %s1005_s21 }
  0x9b   : > { %460 = vmatprep.subr.bf16.mxu0 %v1241_v11  ;;  %p625_p12 = scmp.lt.s32.totalorder (%p2029_p7), %s624_s0, 2 }
  0x9c   : > { %s630_s15 = sadd.s32 (%p2029_p7), %s1029_s7, %s1005_s21 }
  0x9d   : > { %s1008_s24 = sshll.u32 (%p2029_p7), %s630_s15, 3 }
  0x9e   : > { %461 = vmatpush1.bf16.msra.mxu0 %v1243_v12  ;;  %s1893_s3 = scalar_lea.vmem (%p2029_p7), %s2032_s14, %s1008_s24  }
  0x9f   : > { %462 = vmatprep.subr.bf16.mxu0 %v1244_v13 }
  0xa2   : > { %463 = vmatpush1.bf16.msra.mxu0 %v1246_v14 }
  0xa3   : > { %464 = vmatprep.subr.bf16.mxu0 %v1247_v15 }
  0xa6   : > { %465 = vmatpush1.bf16.msra.mxu0 %v1249_v16 }
  0xa9   : > { %483 = vmatmul.mubr.bf16.vlgmr.msra.gmra.mxu0 %v341_v19 }
 0x169   : > { %v484_v27 = vpop.f32.mrf.mxu0 }
 0x16a   : > { %v485_v29 = vadd.f32 %v484_v27, %v363_v25 }
 0x16b   : > { %v486_v28 = vpop.f32.mrf.mxu0 }
 0x16c   : > { %v487_v30 = vadd.f32 %v486_v28, %v367_v26 }
 0x16d   : > { %v488_v31 = vpop.f32.mrf.mxu0 }
 0x16e   : > { %v496_v32 = vmin.f32 %v485_v29, %v487_v30  ;;  %v489_v34 = vadd.f32 %v488_v31, %v363_v25  ;;  %v592_v25 = vunpack.c.l.s4 %v1552_v24 }
 0x16f   : > { %v490_v33 = vpop.f32.mrf.mxu0 }
 0x170   : > { %v491_v35 = vadd.f32 %v490_v33, %v367_v26  ;;  %497 = vmin.xlane.f32.xlu0 %v496_v32 }
 0x172   : > { %v499_v36 = vmin.f32 %v489_v34, %v491_v35 }
 0x174   : > { %500 = vmin.xlane.f32.xlu0 %v499_v36 }
 0x1f9   : > { %v498_v39 = vpop.xlane.xlu0 %497 }
 0x1fa   : > { %vm502_vm0 = vcmp.le.f32.partialorder %v485_v29, %v498_v39  ;;  %vm503_vm1 = vcmp.le.f32.partialorder %v487_v30, %v498_v39  ;;  %v593_v30 = vunpack.c.0.s8 %v592_v25 }
 0x1fb   : > { %v506_v40 = vsel %vm502_vm0, %v1847_v37, 256  ;;  %v507_v41 = vsel %vm503_vm1, %v1850_v38, 256 }
 0x1fc   : > { %vm510_vm2 = vcmp.lt.s32.totalorder %v506_v40, %v507_v41 }
 0x1fd   : > { %v501_v42 = vpop.xlane.xlu0 %500  ;;  %v511_v43 = vsel %vm510_vm2, %v506_v40, %v507_v41 }
 0x1fe   : > { %vm504_vm3 = vcmp.le.f32.partialorder %v489_v34, %v501_v42  ;;  %vm505_vm4 = vcmp.le.f32.partialorder %v491_v35, %v501_v42  ;;  %v513_v44 = vshra.s32 %v511_v43, 16  ;;  %v512_v51 = vand.u32 65535, %v511_v43 }
 0x1ff   : > { %v508_v45 = vsel %vm504_vm3, %v1847_v37, 256  ;;  %v509_v46 = vsel %vm505_vm4, %v1850_v38, 256  ;;  %v596_v35 = vsub.s32 %v593_v30, %v1842_v21 }
 0x200   : > { %vm526_vm5 = vcmp.lt.s32.totalorder %v508_v45, %v509_v46  ;;  %v515_v47 = vcvt.s32.f32 %v513_v44  ;;  %v514_v53 = vcvt.s32.f32 %v512_v51 }
 0x201   : > { %v527_v48 = vsel %vm526_vm5, %v508_v45, %v509_v46 }
 0x202   : > { %516 = vmin.xlane.f32.xlu1 %v515_v47  ;;  %v529_v49 = vshra.s32 %v527_v48, 16  ;;  %v528_v54 = vand.u32 65535, %v527_v48 }
 0x204   : > { %v531_v50 = vcvt.s32.f32 %v529_v49  ;;  %v530_v57 = vcvt.s32.f32 %v528_v54 }
 0x206   : > { %532 = vmin.xlane.f32.xlu1 %v531_v50 }
 0x28b   : > { %v517_v52 = vpop.xlane.xlu1 %516 }
 0x28c   : > { %vm518_vm6 = vcmp.eq.f32.partialorder %v515_v47, %v517_v52  ;;  %v523_v59 = vcvt.f32.s32 %v517_v52 }
 0x28d   : > { %v519_v55 = vsel %vm518_vm6, %v514_v53, inf }
 0x28e   : > { %520 = vmin.xlane.f32.xlu0 %v519_v55  ;;  %v524_v62 = vshll.u32 %v523_v59, 16 }
 0x28f   : > { %v533_v56 = vpop.xlane.xlu1 %532 }
 0x290   : > { %vm534_vm7 = vcmp.eq.f32.partialorder %v531_v50, %v533_v56  ;;  %v539_v63 = vcvt.f32.s32 %v533_v56 }
 0x291   : > { %v535_v58 = vsel %vm534_vm7, %v530_v57, inf }
 0x292   : > { %536 = vmin.xlane.f32.xlu1 %v535_v58  ;;  %v540_v6 = vshll.u32 %v539_v63, 16 }
 0x317   : > { %v521_v60 = vpop.xlane.xlu0 %520 }
 0x318   : > { %v522_v1 = vcvt.f32.s32 %v521_v60 }
 0x31a   : > { %v525_v2 = vadd.s32 %v524_v62, %v522_v1 }
 0x31b   : > { %v537_v5 = vpop.xlane.xlu1 %536 }
 0x31c   : > { %vm542_vm9 = vcmp.eq.s32.totalorder %v1847_v37, %v525_v2  ;;  %vm543_vm10 = vcmp.eq.s32.totalorder %v1850_v38, %v525_v2  ;;  %572 = vst.msk [vmem:[%s1863_s8] sm:$0xff] %vm571_vm8, %v525_v2  ;;  %v538_v7 = vcvt.f32.s32 %v537_v5 }
 0x31d   : > { %v998_v10 = vsel %vm542_vm9, 1.0, %v1551_v9  ;;  %v999_v11 = vsel %vm543_vm10, 1.0, %v1551_v9 }
 0x31e   : > { %v541_v8 = vadd.s32 %v540_v6, %v538_v7  ;;  %v567_v14 = vsel %vm561_vm11, %v998_v10, 0.0  ;;  %v568_v15 = vsel %vm561_vm11, %v999_v11, 0.0 }
 0x320   : > { %vm544_vm13 = vcmp.eq.s32.totalorder %v1847_v37, %v541_v8  ;;  %vm545_vm14 = vcmp.eq.s32.totalorder %v1850_v38, %v541_v8  ;;  %573 = vst.msk [vmem:[%s1863_s8 + $0x8] sm:$0xff] %vm571_vm8, %v541_v8 }
 0x321   : > { %v1000_v12 = vsel %vm544_vm13, 1.0, %v1551_v9  ;;  %v1001_v13 = vsel %vm545_vm14, 1.0, %v1551_v9 }
 0x322   : > { %v569_v16 = vsel %vm562_vm12, %v1000_v12, 0.0  ;;  %v570_v17 = vsel %vm562_vm12, %v1001_v13, 0.0 }
 0x323   : > { %v574_v18 = vadd.f32 %v569_v16, %v567_v14  ;;  %v581_v19 = vadd.f32 %v570_v17, %v568_v15 }
 0x325   : > { %v575_v22 = vrot.slane %v574_v18, 4  ;;  %v582_v23 = vrot.slane %v581_v19, 4 }
 0x327   : > { %v576_v26 = vadd.f32 %v575_v22, %v574_v18  ;;  %v583_v27 = vadd.f32 %v582_v23, %v581_v19 }
 0x329   : > { %v577_v28 = vrot.slane %v576_v26, 2  ;;  %v584_v29 = vrot.slane %v583_v27, 2 }
 0x32b   : > { %v578_v31 = vadd.f32 %v577_v28, %v576_v26  ;;  %v585_v32 = vadd.f32 %v584_v29, %v583_v27 }
 0x32d   : > { %v579_v33 = vrot.slane %v578_v31, 1  ;;  %v586_v34 = vrot.slane %v585_v32, 1 }
 0x32f   : > { %v580_v36 = vadd.f32 %v579_v33, %v578_v31  ;;  %v587_v37 = vadd.f32 %v586_v34, %v585_v32 }
 0x331   : > { %v590_v38 = vcombine.low %v580_v36, %v587_v37 }
 0x333   : > { %v597_v39 = vrot.slane %v590_v38, %v596_v35  ;;  %622 = sbr.rel (!%p2029_p7) target bundleno = 863 (0x35f), region = 48 }
 0x335   : > { %v604_v40 = vrot.slane %v597_v39, %v596_v35 }
 0x337   : > { %610 = vst.msk [vmem:[%s325_s23] sm:$0x3] %vm608_vm15, %v604_v40 }
 0x338   : > { %s2069_s0 = smov (!%p625_p12, %s624_s0), 2 }
 0x339   : > { %s1006_s17 = sshll.u32 %s2069_s0, 7 }
 0x33a   : > { %p1009_p13 = scmp.eq.s32.totalorder %s1006_s17, 0 }
 0x33b   : > { %s1897_s12 = sshrl.u32 (!%p1009_p13), %s2069_s0, 1 }
 0x33c   : > { %635 = sbr.rel (%p1009_p13) target bundleno = 863 (0x35f), region = 52  ;;  %p1010_p9 = scmp.le.s32.totalorder (!%p1009_p13), %s1897_s12, 0 }
 0x341   : > { %873 = sbr.rel (%p1010_p9) target bundleno = 846 (0x34e), region = 167  ;;  %s1510_s26 = smov (!%p1010_p9), %s1893_s3  }
 0x342   : > { %s1514_s4 = smov (!%p1010_p9), %s1863_s8   ;;  %s1518_s29 = smov (!%p1010_p9), 0  }
 0x343   : > { %s1522_s11 = smov (!%p1010_p9), 0  }
 0x346 LB: >> { %v700_v20 = vld [vmem:[%s1516_s4] sm:$0xff]  ;;  %v702_v21 = vld [vmem:[%s1516_s4 + $0x8] sm:$0xff]  ;;  %s704_s10 = sadd.s32 1, %s1520_s29  ;;  %s694_s11 = sadd.s32 1, %s1524_s11   ;;  %s1524_s11 = sphi %s1522_s11, %s694_s11   ;;  %s1520_s29 = sphi %s1518_s29, %s1519_s29   ;;  %s1516_s4 = sphi %s1514_s4, %s709_s4   ;;  %s1512_s26 = sphi %s1510_s26, %s710_s26  }
 0x347   : >> { %701 = vst [vmem:[%s1512_s26] sm:$0xff] %v700_v20  ;;  %703 = vst [vmem:[%s1512_s26 + $0x8] sm:$0xff] %v702_v21  ;;  %p705_p1 = scmp.ge.s32.totalorder %s704_s10, %s1897_s12  ;;  %p693_p11 = scmp.ge.s32.totalorder %s694_s11, %s1897_s12 }
 0x349   : >> { %s2071_s10 = smov (%p705_p1, %s704_s10), 0  ;;  %696 = sbr.rel (!%p693_p11) target bundleno = 838 (0x346), region = 173 }
 0x34a   : >> { %s1011_s13 = sshll.u32 %s2071_s10, 4  ;;  %s1519_s29 = smov %s2071_s10  }
 0x34b   : >> { %s709_s4 = scalar_lea.vmem %s1863_s8, %s1011_s13 [#allocation8]   ;;  %s710_s26 = scalar_lea.vmem %s1893_s3, %s1011_s13  }
 0x34e PF: > { %s1907_s5 = sand.u32 1, %s2069_s0   ;;  %s1026_s6 = sshll.u32 %s1897_s12, 4 }
 0x34f   : > { %s715_s21 = scalar_lea.vmem %s1863_s8, %s1026_s6 [#allocation8]   ;;  %s717_s7 = scalar_lea.vmem %s1893_s3, %s1026_s6  }
 0x350   : > { %p1016_p0 = scmp.le.s32.totalorder %s1907_s5, 0 }
 0x351   : > { %s1526_s15 = smov (!%p1016_p0), %s717_s7   ;;  %s1530_s24 = smov (!%p1016_p0), %s715_s21  }
 0x352   : > { %887 = sbr.rel (%p1016_p0) target bundleno = 863 (0x35f), region = 178  ;;  %s1534_s18 = smov (!%p1016_p0), 0  }
 0x353   : > { %s1538_s30 = smov (!%p1016_p0), 0  }
 0x357 LB: >> { %v727_v41 = vld [vmem:[%s1532_s24] sm:$0xff]  ;;  %s729_s0 = sadd.s32 1, %s1536_s18  ;;  %s721_s30 = sadd.s32 1, %s1540_s30   ;;  %s1540_s30 = sphi %s1538_s30, %s721_s30   ;;  %s1536_s18 = sphi %s1534_s18, %s1535_s18   ;;  %s1532_s24 = sphi %s1530_s24, %s734_s24   ;;  %s1528_s15 = sphi %s1526_s15, %s735_s15  }
 0x358   : >> { %728 = vst [vmem:[%s1528_s15] sm:$0xff] %v727_v41  ;;  %p730_p2 = scmp.ge.s32.totalorder %s729_s0, %s1907_s5  ;;  %p720_p4 = scmp.ge.s32.totalorder %s721_s30, %s1907_s5 }
 0x35a   : >> { %s2073_s0 = smov (%p730_p2, %s729_s0), 0  ;;  %723 = sbr.rel (!%p720_p4) target bundleno = 855 (0x357), region = 184 }
 0x35b   : >> { %s1017_s8 = sshll.u32 %s2073_s0, 3  ;;  %s1535_s18 = smov %s2073_s0  }
 0x35c   : >> { %s734_s24 = scalar_lea.vmem %s715_s21, %s1017_s8 [#allocation8]   ;;  %s735_s15 = scalar_lea.vmem %s717_s7, %s1017_s8  }
 0x35f PF: > { %s2033_s14 = sld [smem:[#allocation17_spill]]  ;;  %s751_s26 = sshll.u32 %s325_s23, 4  ;;  %s752_s26 = int_to_ptr.vmem [resolvable:$true] %s751_s26 }
 0x360   : > { %s2034_s3 = sld [smem:[#allocation16_spill]]  ;;  %s1328_s15 = scalar_lea.vmem %s752_s26, 32 }
 0x361   : > { %s2035_s17 = sld [smem:[#allocation23_spill]]  ;;  %p1329_p8 = scmp.ne.s32.totalorder %s752_s26, %s1328_s15 }
 0x362   : > { %s2036_s13 = sld [smem:[#allocation28_spill]]  ;;  %s1553_s5 = smov [#allocation9]  }
 0x363   : > { %s1332_s21 = sshll.u32 %s1553_s5, 4  ;;  %s1333_s21 = int_to_ptr.vmem [resolvable:$false] %s1332_s21 }
 0x364   : > { %s1334_s7 = scalar_lea.vmem %s1333_s21, 64  ;;  %p1335_p6 = scmp.lt.s32.totalorder %s752_s26, %s1333_s21 }
 0x365   : > { %s742_s12 = smul.u32 3, %s2033_s14  ;;  %p1336_p7 = scmp.lt.s32.totalorder %s1334_s7, %s1328_s15 }
 0x367   : > { %s743_s4 = sadd.s32 %s2034_s3, %s742_s12  ;;  %p2037_p10 = scmp.ne.s32.totalorder %s2035_s17, 0 }
 0x368   : > { %s1028_s29 = sshll.u32 %s743_s4, 5  ;;  %p1337_p12 = por %p1336_p7, %p1335_p6 }
 0x369   : > { %s749_s6 = scalar_lea.hbm %s2036_s13, %s1028_s29  ;;  %p1330_p3 = pnand %p1329_p8, %p2037_p10 }
 0x36b   : > { %p1331_p5 = pneg %p1330_p3 }
 0x36d   : > { %p1338_p13 = pnand %p1337_p12, %p1331_p5 }
 0x36f   : > { %1341 = shalt.err (!%p1338_p13)
}
 0x370   : > { %s1342_s9 = scalar_lea.hbm %s749_s6, 32  ;;  %s1346_s18 = scalar_lea.hbm %s2036_s13, 384 }
 0x371   : > { %p1343_p9 = scmp.ne.s32.totalorder %s749_s6, %s1342_s9  ;;  %p1347_p0 = scmp.lt.s32.totalorder %s749_s6, %s2036_s13 }
 0x372   : > { %p1348_p2 = scmp.lt.s32.totalorder %s1346_s18, %s1342_s9 }
 0x373   : > { %p1344_p1 = pnand %p1343_p9, %p2037_p10 }
 0x374   : > { %p1349_p4 = por %p1348_p2, %p1347_p0 }
 0x375   : > { %p1345_p11 = pneg %p1344_p1 }
 0x377   : > { %p1350_p8 = pnand %p1349_p4, %p1345_p11 }
 0x379   : > { %1353 = shalt.err (!%p1350_p8)
}
 0x37a   : > { %1035 = dma.vmem_to_hbm [thread:$0]  (%p2037_p10), %s752_s26, 32, %s749_s6, %s1882_s25  }
 0x37b PF: > { %s2038_s8 = sld [smem:[#allocation13_spill]]  ;;  %p1041_p3 = scmp.ge.s32.totalorder %s1508_s28, 2 }
 0x37c   : > { %s2039_s14 = sld [smem:[#allocation25_spill]] }
 0x381   : > { %s770_s3 = sand.u32 1, %s2038_s8  }
 0x382   : > { %p2040_p5 = scmp.ne.s32.totalorder %s2039_s14, 0  ;;  %s771_s12 = scalar_lea.sflag [#allocation4], %s770_s3 }
 0x384   : > { %p1038_p6 = pnand %p1041_p3, %p2040_p5 }
 0x386   : > { %p1039_p7 = pneg %p1038_p6 }
 0x388   : > { %1451 = dma.done.wait (%p1039_p7), %s771_s12, 32  }
 0x389   : > { %1453 = vsyncadd (%p1039_p7), %s771_s12, 4294967264  ;;  %s24_s28 = sadd.s32 1, %s1508_s28   ;;  %s2042_s25 = sld [smem:[#allocation14_spill]] }
 0x38a   : > { %p1940_p12 = scmp.ge.s32.totalorder %s24_s28, 14   ;;  %s2043_s17 = sld [smem:[#allocation24_spill]] }
 0x38b   : > { %s2044_s26 = sld [smem:[#allocation21_spill]]  ;;  %s2050_s15 = smov %s1460_s16 }
 0x38c   : > { %s2045_s29 = sld [smem:[#allocation15_spill]]  ;;  %s2052_s18 = smov %s1472_s19 }
 0x38d   : > { %s2046_s23 = sld [smem:[#allocation22_spill]]  ;;  %s2053_s19 = smov %s1476_s20 }
 0x38e   : > { %s2047_s24 = sld [smem:[#allocation18_spill]]  ;;  %s2055_s21 = smov %s1484_s22 }
 0x38f   : > { %s2048_s11 = sld [smem:[#allocation19_spill]]  ;;  %s2051_s16 = smov %s2042_s25 }
 0x390   : > { %s2049_s10 = sld [smem:[#allocation20_spill]]  ;;  %s2057_s25 = smov %s1504_s27 }
 0x391   : > { %s2054_s20 = smov %s2044_s26 }
 0x392   : > { %s2056_s22 = smov %s2045_s29  ;;  %23 = sbr.rel (!%p1940_p12) target bundleno = 16 (0x10), region = 195 }
 0x395   : > { %s2058_s26 = smov %s2048_s11 }
 0x396   : > { %s2059_s27 = smov %s2049_s10 }
 0x397   :  { %776 = vsyncpa [#allocation3], 1 }
 0x398   :  { %778 = vsyncpa [#allocation3 + $0x1], 1 }
 0x399   :  { %779 = vsyncpa [#allocation6], 1 }
 0x39a   :  { %781 = vsyncpa [#allocation6 + $0x1], 1 }
 0x39b   :  { %782 = vsyncpa [#allocation4], 1 }
 0x39c   :  { %784 = vsyncpa [#allocation4 + $0x1], 1 }

</bundles_post_ra>
